<compile_context>
chip_gen: v5e
topology: v5e:2x2
jax: 0.10.0
libtpu: 0.0.40
codegen_flags: <defaults>
</compile_context>

<pallas_src>
import numpy as np
import jax
import jax.numpy as jnp
from jax import lax
from jax.experimental import pallas as pl
from jax.experimental.pallas import tpu as pltpu


def _l2norm_kernel(x_ref, o_ref):
    # Cast in-kernel: input DMA stays in native dtype, math runs in f32.
    x = x_ref[...].astype(jnp.float32)               # (tb, D) tile
    ssq = jnp.sum(x * x, axis=1, keepdims=True)      # (tb, 1) row sum of squares (XLU)
    inv = lax.rsqrt(ssq)                             # EUP: replaces sqrt + divide
    # Note: all-zero rows give rsqrt(0)=inf -> NaN, mirroring the reference's
    # divide-by-zero (no eps is added, same as the torch module).
    o_ref[...] = (x * inv).astype(o_ref.dtype)


def _vmem_capacity_bytes():
    try:
        return int(pltpu.get_tpu_info().vmem_capacity_bytes)
    except Exception:
        return 64 * 1024 * 1024  # conservative default (v7x per-TensorCore)


def _pick_block_rows(B, bytes_per_row, max_tile_bytes):
    """Rows per tile: multiple of 8, tile under max_tile_bytes, >=2 grid steps."""
    b_padded = ((B + 7) // 8) * 8
    cap = max(8, (max_tile_bytes // max(1, bytes_per_row)) // 8 * 8)
    tb = min(b_padded, cap)
    # Prefer >= 2 grid steps when B allows it (megacore on v7x, DMA overlap).
    if tb >= b_padded and b_padded >= 16:
        tb = ((b_padded // 2 + 7) // 8) * 8
    return tb


def embed_null_forward(x):
    """Pallas forward of Embed_Null: flatten to (B, -1), L2-normalize each row."""
    B = x.shape[0]
    x2d = x.reshape(B, -1)                           # keep native dtype (cast in-kernel)
    D = x2d.shape[1]

    in_dtype = x2d.dtype
    out_dtype = in_dtype if jnp.issubdtype(in_dtype, jnp.floating) else jnp.float32

    # Generation-aware VMEM budgeting.
    vmem_cap = _vmem_capacity_bytes()
    big_vmem = vmem_cap >= 128 * 1024 * 1024         # v5e / v6e
    max_tile_bytes = (8 if big_vmem else 4) * 1024 * 1024

    bytes_per_row = D * (jnp.dtype(in_dtype).itemsize + jnp.dtype(out_dtype).itemsize)
    tb = _pick_block_rows(B, bytes_per_row, max_tile_bytes)
    grid = (pl.cdiv(B, tb),)

    # Double-buffered in+out tiles plus headroom, never above ~75% of physical VMEM.
    needed = 2 * tb * bytes_per_row
    vmem_limit = int(min(int(0.75 * vmem_cap),
                         max(32 * 1024 * 1024, 2 * needed)))

    return pl.pallas_call(
        _l2norm_kernel,
        out_shape=jax.ShapeDtypeStruct((B, D), out_dtype),
        grid=grid,
        in_specs=[pl.BlockSpec((tb, D), lambda i: (i, 0))],
        out_specs=pl.BlockSpec((tb, D), lambda i: (i, 0)),
        compiler_params=pltpu.CompilerParams(
            dimension_semantics=("parallel",),
            vmem_limit_bytes=vmem_limit,
        ),
    )(x2d)


class EmbedNullPallas:
    """Mirror of torch Embed_Null (dim_in/dim_out are unused, as in the reference)."""

    def __init__(self, dim_in=1024, dim_out=128):
        self.dim_in = dim_in
        self.dim_out = dim_out
        # no parameters: Embed_Null only flattens and L2-normalizes

    def __call__(self, x):
        return embed_null_forward(x)


if __name__ == "__main__":
    key = jax.random.PRNGKey(0)
    # small shapes consistent with the module: x.view(B, -1) -> (16, 1024)
    x = jax.random.normal(key, (16, 4, 16, 16), jnp.float32)

    model = EmbedNullPallas(dim_in=4 * 16 * 16, dim_out=128)
    y = model(x)
    jax.block_until_ready(y)

    # correctness check vs. pure-JAX reference of the torch module (f32 input)
    x2d = x.reshape(x.shape[0], -1)
    ref = x2d / jnp.sqrt(jnp.sum(x2d * x2d, axis=1, keepdims=True))
    np.testing.assert_allclose(np.asarray(y), np.asarray(ref), rtol=2e-5, atol=2e-6)

    # also exercise the in-kernel dtype cast path (bf16 input, bf16 output)
    xb = x.astype(jnp.bfloat16)
    yb = model(xb)
    jax.block_until_ready(yb)
    assert yb.dtype == jnp.bfloat16
    xb2d = xb.reshape(xb.shape[0], -1).astype(jnp.float32)
    refb = xb2d / jnp.sqrt(jnp.sum(xb2d * xb2d, axis=1, keepdims=True))
    np.testing.assert_allclose(np.asarray(yb, dtype=np.float32), np.asarray(refb),
                               rtol=2e-2, atol=2e-2)

    print("KERNEL_OK")
</pallas_src>

<mosaic_0001>
module attributes {stable_mosaic.version = 11 : i64} {
  func.func @_l2norm_kernel(%arg0: i32, %arg1: memref<8x1024xf32, #tpu.memory_space<vmem>>, %arg2: memref<8x1024xf32, #tpu.memory_space<vmem>>) attributes {dimension_semantics = [#tpu.dimension_semantics<parallel>], iteration_bounds = array<i64: 2>, scalar_prefetch = 0 : i64, scratch_operands = 0 : i64, tpu.core_type = #tpu.core_type<tc>, window_params = [{transform_indices = @transform_0, window_bounds = array<i64: 8, 1024>}, {transform_indices = @transform_1, window_bounds = array<i64: 8, 1024>}]} {
    %c0 = arith.constant 0 : index
    %c0_0 = arith.constant 0 : index
    %0 = vector.load %arg1[%c0, %c0_0] : memref<8x1024xf32, #tpu.memory_space<vmem>>, vector<8x1024xf32>
    %1 = arith.mulf %0, %0 : vector<8x1024xf32>
    %cst = arith.constant dense<0.000000e+00> : vector<8xf32>
    %2 = vector.multi_reduction <add>, %1, %cst [1] : vector<8x1024xf32> to vector<8xf32>
    %3 = vector.shape_cast %2 : vector<8xf32> to vector<8x1xf32>
    %4 = math.rsqrt %3 : vector<8x1xf32>
    %5 = vector.broadcast %4 : vector<8x1xf32> to vector<8x1024xf32>
    %6 = arith.mulf %0, %5 : vector<8x1024xf32>
    %c0_1 = arith.constant 0 : index
    %c0_2 = arith.constant 0 : index
    %7 = vector.load %arg2[%c0_1, %c0_2] : memref<8x1024xf32, #tpu.memory_space<vmem>>, vector<8x1024xf32>
    tpu.vector_store %arg2[%c0_1, %c0_2], %6 {strides = array<i32>} : memref<8x1024xf32, #tpu.memory_space<vmem>>, vector<8x1024xf32>,
    return
  }
  func.func @transform_0(%arg0: i32) -> (i32, i32) {
    %c0_i32 = arith.constant 0 : i32
    %c0_i32_0 = arith.constant 0 : i32
    return %arg0, %c0_i32 : i32, i32
  }
  func.func @transform_1(%arg0: i32) -> (i32, i32) {
    %c0_i32 = arith.constant 0 : i32
    %c0_i32_0 = arith.constant 0 : i32
    return %arg0, %c0_i32 : i32, i32
  }
}

</mosaic_0001>

<bundles_post_ra>
// kernel: tpu_custom_call.1
= control target key start
LH: loop header
LB: loop body
LE: loop exit
PB: predicated region body
PF: predicated region fallthrough
CT: control target
= control target key end

     0   :  { %6 = vsyncpa [#allocation3], 0  ;;  %s576_s0 = inlined_call_operand.hbm [shape: f32[16,1024], index: 0, kind: input, shape index: {}]   ;;  %s577_s1 = inlined_call_operand.hbm [shape: f32[16,1024], index: 1, kind: output, shape index: {}]  }
   0x1   :  { %8 = vsyncpa [#allocation3 + $0x1], 0 }
   0x2   :  { %9 = vsyncpa [#allocation4], 0 }
   0x3   :  { %11 = vsyncpa [#allocation4 + $0x1], 0  ;;  %s445_s6 = smov 0   ;;  %s447_s7 = smov 0  }
   0x4   :  { %s449_s8 = smov 0   ;;  %s451_s9 = smov 0  }
   0x5 LB: > { %s466_s10 = sadd.s32 4294967295, %s433_s9   ;;  %s273_s11 = sadd.s32 4294967294, %s433_s9   ;;  %s433_s9 = sphi %s451_s9, %s587_s9   ;;  %s429_s8 = sphi %s449_s8, %s586_s8   ;;  %s425_s7 = sphi %s447_s7, %s585_s7   ;;  %s421_s6 = sphi %s445_s6, %s584_s6  }
   0x6   : > { %s470_s12 = sadd.s32 1, %s433_s9   ;;  %s24_s13 = sadd.s32 1, %s429_s8 }
   0x7   : > { %s21_s14 = ssub.s32 %s433_s9, %s470_s12  ;;  %p31_p0 = scmp.ne.s32.totalorder %s429_s8, %s425_s7 }
   0x8   : > { %p22_p1 = scmp.eq.s32.totalorder %s21_s14, 0  ;;  %p32_p2 = scmp.eq.s32.totalorder %s433_s9, 0 }
   0x9   : > { %p37_p3 = scmp.ne.s32.totalorder %s425_s7, %s421_s6  ;;  %p38_p4 = scmp.eq.s32.totalorder %s466_s10, 0 }
   0xa   : > { %s482_s15 = scalar_select %p22_p1, %s429_s8, %s24_s13  }
   0xb   : > { %p484_p5 = por %p32_p2, %p31_p0  ;;  %p488_p6 = por %p38_p4, %p37_p3 }
   0xc   : > { %p61_p7 = scmp.eq.s32.totalorder %s466_s10, 1  ;;  %p67_p8 = scmp.eq.s32.totalorder %s273_s11, 1 }
   0xd   : > { %p301_p10 = scmp.lt.s32.totalorder %s433_s9, 2  ;;  %s87_s20 = sand.u32 1, %s429_s8  }
   0xe   : > { %p495_p11 = por %p61_p7, %p31_p0  ;;  %p499_p12 = por %p67_p8, %p37_p3 }
   0xf   : > { %s287_s21 = sshll.u32 %s433_s9, 6  ;;  %s276_s22 = sshll.u32 %s87_s20, 6 }
  0x10   : > { %s96_s25 = scalar_lea.hbm %s576_s0, %s287_s21  ;;  %s91_s27 = scalar_lea.vmem [#allocation2], %s276_s22 }
  0x11   : > { %s98_s26 = sshll.u32 %s96_s25, 4  ;;  %s100_s28 = sshll.u32 %s91_s27, 4  ;;  %s99_s26 = int_to_ptr.hbm [resolvable:$true] %s98_s26  ;;  %s101_s28 = int_to_ptr.vmem [resolvable:$true] %s100_s28 }
  0x12   : > { %p510_p13 = pnand %p301_p10, %p484_p5  ;;  %p279_p0 = scmp.ge.s32.totalorder %s433_s9, 1 }
  0x13   : > { %p105_p1 = scmp.lt.s32.totalorder %s433_s9, 3  ;;  %s88_s30 = scalar_lea.sflag [#allocation3], %s87_s20 }
  0x14   : > { %s337_s2 = sshra.s32 %s99_s26, 4  ;;  %p341_p3 = pneg %p510_p13  ;;  %s338_s2 = int_to_ptr.hbm [resolvable:$true] %s337_s2 }
  0x15   : > { %s339_s3 = scalar_lea.hbm %s338_s2, 64  ;;  %s344_s11 = scalar_lea.hbm %s576_s0, 128 }
  0x16   : > { %p340_p2 = scmp.ne.s32.totalorder %s338_s2, %s339_s3  ;;  %p345_p5 = scmp.lt.s32.totalorder %s338_s2, %s576_s0 }
  0x17   : > { %p346_p8 = scmp.lt.s32.totalorder %s344_s11, %s339_s3 }
  0x18   : > { %p342_p4 = pnand %p341_p3, %p340_p2 }
  0x19   : > { %p347_p10 = por %p346_p8, %p345_p5 }
  0x1a   : > { %p343_p7 = pneg %p342_p4 }
  0x1c   : > { %p348_p9 = pnand %p347_p10, %p343_p7 }
  0x1e   : > { %351 = shalt.err (!%p348_p9)
}
  0x1f   : > { %296 = dma.hbm_to_vmem [thread:$0]  (!%p510_p13), %s99_s26, 1024, %s101_s28, %s88_s30  }
  0x20   : > { %p106_p2 = pnand %p279_p0, %p105_p1 }
  0x21   : > { %s531_s16 = sand.u32 (!%p106_p2), 1, %s425_s7  }
  0x22   : > { %109 = sbr.rel (%p106_p2) target bundleno = 203 (0xcb), region = 24  ;;  %s280_s20 = sshll.u32 (!%p106_p2), %s531_s16, 6 }
  0x23   : > { %s112_s21 = scalar_lea.sflag (!%p106_p2), [#allocation3], %s531_s16  ;;  %s115_s22 = scalar_lea.vmem (!%p106_p2), [#allocation2], %s280_s20 }
  0x27   : > { %412 = dma.done.wait (%p488_p6), %s112_s21, 1024  }
  0x28   : > { %414 = vsyncadd (%p488_p6), %s112_s21, 4294966272  ;;  %v135_v0 = vld [vmem:[%s115_s22] sm:$0xff]  ;;  %v136_v1 = vld [vmem:[%s115_s22 + $0x8] sm:$0xff]  ;;  %s288_s17 = sshll.u32 %s466_s10, 6  ;;  %s134_s26 = scalar_lea.vmem [#allocation5], %s280_s20 }
  0x29   : > { %v137_v2 = vld [vmem:[%s115_s22 + $0x10] sm:$0xff]  ;;  %v138_v3 = vld [vmem:[%s115_s22 + $0x18] sm:$0xff]  ;;  %v143_v4 = vmul.f32 %v135_v0, %v135_v0  ;;  %v144_v5 = vmul.f32 %v136_v1, %v136_v1  ;;  %v139_v7 = vld [vmem:[%s115_s22 + $0x20] sm:$0xff]  ;;  %s198_s25 = scalar_lea.hbm %s577_s1, %s288_s17  ;;  %s200_s10 = sshll.u32 %s134_s26, 4  ;;  %s201_s10 = int_to_ptr.vmem [resolvable:$true] %s200_s10 }
  0x2a   : > { %v145_v6 = vmul.f32 %v137_v2, %v137_v2  ;;  %v146_v8 = vmul.f32 %v138_v3, %v138_v3  ;;  %v140_v10 = vld [vmem:[%s115_s22 + $0x28] sm:$0xff]  ;;  %v147_v11 = vmul.f32 %v139_v7, %v139_v7  ;;  %v141_v13 = vld [vmem:[%s115_s22 + $0x30] sm:$0xff]  ;;  %v142_v16 = vld [vmem:[%s115_s22 + $0x38] sm:$0xff]  ;;  %s202_s27 = sshll.u32 %s198_s25, 4  ;;  %s187_s28 = scalar_lea.sflag [#allocation4], %s531_s16  ;;  %s203_s27 = int_to_ptr.hbm [resolvable:$true] %s202_s27 }
  0x2b   : > { %v151_v9 = vadd.f32 %v144_v5, %v143_v4  ;;  %v148_v14 = vmul.f32 %v140_v10, %v140_v10  ;;  %v149_v17 = vmul.f32 %v141_v13, %v141_v13  ;;  %v150_v19 = vmul.f32 %v142_v16, %v142_v16  ;;  %s381_s29 = sshra.s32 %s203_s27, 4  ;;  %s387_s4 = scalar_lea.hbm %s577_s1, 128  ;;  %s382_s29 = int_to_ptr.hbm [resolvable:$true] %s381_s29 }
  0x2c   : > { %s383_s30 = scalar_lea.hbm %s382_s29, 64  ;;  %p388_p0 = scmp.lt.s32.totalorder %s382_s29, %s577_s1 }
  0x2d   : > { %v152_v12 = vadd.f32 %v151_v9, %v145_v6  ;;  %p384_p6 = scmp.ne.s32.totalorder %s382_s29, %s383_s30  ;;  %p389_p1 = scmp.lt.s32.totalorder %s387_s4, %s383_s30 }
  0x2f   : > { %v153_v15 = vadd.f32 %v152_v12, %v146_v8  ;;  %p385_p9 = pnand %p384_p6, %p495_p11  ;;  %p390_p3 = por %p389_p1, %p388_p0 }
  0x31   : > { %v154_v18 = vadd.f32 %v153_v15, %v147_v11  ;;  %p386_p13 = pneg %p385_p9 }
  0x33   : > { %v155_v20 = vadd.f32 %v154_v18, %v148_v14  ;;  %p391_p4 = pnand %p390_p3, %p386_p13 }
  0x35   : > { %v156_v21 = vadd.f32 %v155_v20, %v149_v17 }
  0x37   : > { %v157_v22 = vadd.f32 %v156_v21, %v150_v19 }
  0x39   : > { %158 = vadd.xlane.f32.xlu0 %v157_v22 }
  0xac   : > { %v159_v23 = vpop.xlane.xlu0 %158 }
  0xad   : > { %335 = vrsqrt.f32 %v159_v23  ;;  %vm166_vm1 = vweird.f32 %v159_v23 }
  0xb3   : > { %v336_v24 = vpop.eup %335 }
  0xb4   : > { %v161_v25 = vmul.f32 %v336_v24, %v159_v23  ;;  %vm167_vm0 = vweird.f32 %v336_v24 }
  0xb5   : > { %vm168_vm2 = vmor %vm166_vm1, %vm167_vm0 }
  0xb6   : > { %v162_v26 = vmul.f32 %v336_v24, %v161_v25 }
  0xb8   : > { %v163_v27 = vmul.f32 0.5, %v162_v26 }
  0xba   : > { %v164_v28 = vsub.f32 1.5, %v163_v27 }
  0xbc   : > { %v165_v29 = vmul.f32 %v336_v24, %v164_v28 }
  0xbe   : > { %v169_v30 = vsel %vm168_vm2, %v336_v24, %v165_v29 }
  0xbf   : > { %v170_v31 = vmul.f32 %v169_v30, %v135_v0  ;;  %v171_v32 = vmul.f32 %v169_v30, %v136_v1  ;;  %v172_v33 = vmul.f32 %v169_v30, %v137_v2  ;;  %v173_v34 = vmul.f32 %v169_v30, %v138_v3 }
  0xc0   : > { %v174_v35 = vmul.f32 %v169_v30, %v139_v7  ;;  %v175_v36 = vmul.f32 %v169_v30, %v140_v10  ;;  %v176_v37 = vmul.f32 %v169_v30, %v141_v13  ;;  %v177_v38 = vmul.f32 %v169_v30, %v142_v16 }
  0xc1   : > { %178 = vst [vmem:[%s134_s26] sm:$0xff] %v170_v31 }
  0xc2   : > { %179 = vst [vmem:[%s134_s26 + $0x8] sm:$0xff] %v171_v32 }
  0xc3   : > { %180 = vst [vmem:[%s134_s26 + $0x10] sm:$0xff] %v172_v33 }
  0xc4   : > { %181 = vst [vmem:[%s134_s26 + $0x18] sm:$0xff] %v173_v34 }
  0xc5   : > { %182 = vst [vmem:[%s134_s26 + $0x20] sm:$0xff] %v174_v35 }
  0xc6   : > { %183 = vst [vmem:[%s134_s26 + $0x28] sm:$0xff] %v175_v36 }
  0xc7   : > { %184 = vst [vmem:[%s134_s26 + $0x30] sm:$0xff] %v176_v37 }
  0xc8   : > { %185 = vst [vmem:[%s134_s26 + $0x38] sm:$0xff] %v177_v38 }
  0xc9   : > { %394 = shalt.err (!%p391_p4)
}
  0xca   : > { %291 = dma.vmem_to_hbm [thread:$0]  (%p495_p11), %s201_s10, 1024, %s203_s27, %s187_s28  }
  0xcb PF: > { %s214_s13 = sand.u32 1, %s421_s6   ;;  %p583_p7 = scmp.ge.s32.totalorder %s433_s9, 2 }
  0xcc   : > { %s215_s14 = scalar_lea.sflag [#allocation4], %s214_s13 }
  0xcd   : > { %p298_p5 = pnand %p583_p7, %p499_p12 }
  0xcf   : > { %p299_p8 = pneg %p298_p5 }
  0xd1   : > { %416 = dma.done.wait (%p299_p8), %s215_s14, 1024  }
  0xd2   : > { %418 = vsyncadd (%p299_p8), %s215_s14, 4294966272  ;;  %p14_p10 = scmp.ge.s32.totalorder %s470_s12, 4   ;;  %s584_s6 = smov %s425_s7 }
  0xd3   : > { %s585_s7 = smov %s429_s8  ;;  %s586_s8 = smov %s482_s15 }
  0xd4   : > { %s587_s9 = smov %s470_s12  ;;  %16 = sbr.rel (!%p14_p10) target bundleno = 5 (0x5), region = 69 }
  0xd9   :  { %221 = vsyncpa [#allocation3], 1 }
  0xda   :  { %223 = vsyncpa [#allocation3 + $0x1], 1 }
  0xdb   :  { %224 = vsyncpa [#allocation4], 1 }
  0xdc   :  { %226 = vsyncpa [#allocation4 + $0x1], 1 }

</bundles_post_ra>
